<compile_context>
chip_gen: v7x
topology: tpu7x:2x2x1
jax: 0.10.0
libtpu: 0.0.40
codegen_flags: <defaults>
</compile_context>

<pallas_src>
import jax
import jax.numpy as jnp
from jax import lax
from jax.experimental import pallas as pl
from jax.experimental.pallas import tpu as pltpu


_MAX_ROWS = 4096                 # 4096 rows * 128 lanes = 512K voxels / tile
_DEFAULT_VMEM = 64 * 1024 * 1024  # assume v7x-sized VMEM if query fails


def _vmem_capacity_bytes():
    try:
        return int(pltpu.get_tpu_info().vmem_capacity_bytes)
    except Exception:
        return _DEFAULT_VMEM


def _pick_rows(R, per_row_bytes, vmem_cap):
    """Rows (of 128 lanes) per tile, budgeted against this chip's VMEM."""
    budget = int(vmem_cap * 0.45)          # dbl-buffered inputs + temporaries
    rows = budget // max(per_row_bytes, 1)
    rows = min(rows, _MAX_ROWS)
    if rows >= R:
        return R                            # whole volume in one tile
    if rows >= 32:
        rows = (rows // 32) * 32            # safe for int8/uint8 targets too
    else:
        rows = (rows // 8) * 8
    rows = max(rows, 8)
    return min(rows, R)


def _vmem_limit(vmem_cap):
    return min(int(vmem_cap * 0.85), 100 * 1024 * 1024)


# ---------------------------------------------------------------------------
# Pallas kernels: fused three-way spatial reductions
# ---------------------------------------------------------------------------
def _dice_sums_mask(source4, target4, R):
    """source4: (B, C, R, 128) float; target4: (B, 1, R, 128) class indices.

    Returns (intersection, source_volume, target_volume), each (B, C) f32.
    """
    B, C = source4.shape[0], source4.shape[1]
    src_es = source4.dtype.itemsize
    tgt_es = target4.dtype.itemsize
    vmem_cap = _vmem_capacity_bytes()
    # Per 128-lane row: double-buffered inputs + ~4C+2 f32 in-kernel temps.
    per_row = 128 * (2 * C * src_es + 2 * tgt_es + (4 * C + 2) * 4)
    rows = _pick_rows(R, per_row, vmem_cap)
    n_tiles = pl.cdiv(R, rows)
    ragged = (R % rows) != 0
    sub = 8 if (rows % 8 == 0 and rows >= 8) else 1

    def kernel(src_ref, tgt_ref, inter_ref, svol_ref, tvol_ref):
        v = pl.program_id(1)

        @pl.when(v == 0)
        def _init():
            inter_ref[...] = jnp.zeros_like(inter_ref)
            svol_ref[...] = jnp.zeros_like(svol_ref)
            tvol_ref[...] = jnp.zeros_like(tvol_ref)

        def accumulate(mask_rows):
            s = src_ref[...].astype(jnp.float32)               # (C, rows, 128)
            t = tgt_ref[...].astype(jnp.int32)                 # (1, rows, 128)
            cls = lax.broadcasted_iota(jnp.int32, (C, rows, 128), 0)
            of = (t == cls).astype(jnp.float32)                # in-kernel 1-hot
            if mask_rows:
                ridx = lax.broadcasted_iota(jnp.int32, (1, rows, 128), 1)
                valid = (v * rows + ridx) < R
                s = jnp.where(valid, s, 0.0)
                of = jnp.where(valid, of, 0.0)
            if sub == 8:
                s4 = s.reshape(C, rows // 8, 8, 128)
                of4 = of.reshape(C, rows // 8, 8, 128)
                inter_ref[...] += jnp.sum(s4 * of4, axis=1)
                svol_ref[...] += jnp.sum(s4, axis=1)
                tvol_ref[...] += jnp.sum(of4, axis=1)
            else:
                inter_ref[...] += jnp.sum(s * of, axis=1, keepdims=True)
                svol_ref[...] += jnp.sum(s, axis=1, keepdims=True)
                tvol_ref[...] += jnp.sum(of, axis=1, keepdims=True)

        if ragged:
            @pl.when(v != n_tiles - 1)
            def _steady():
                accumulate(False)

            @pl.when(v == n_tiles - 1)
            def _tail():
                accumulate(True)
        else:
            accumulate(False)

    out_shape = tuple(jax.ShapeDtypeStruct((B, C, sub, 128), jnp.float32)
                      for _ in range(3))
    out_spec = pl.BlockSpec((None, C, sub, 128), lambda b, v: (b, 0, 0, 0))
    V = R * 128
    cost = pl.CostEstimate(
        flops=int(6 * B * C * V), transcendentals=0,
        bytes_accessed=int(B * C * V * src_es + B * V * tgt_es
                           + 3 * B * C * sub * 128 * 4))

    inter, svol, tvol = pl.pallas_call(
        kernel,
        out_shape=out_shape,
        grid_spec=pltpu.PrefetchScalarGridSpec(
            num_scalar_prefetch=0,
            grid=(B, n_tiles),
            in_specs=[
                pl.BlockSpec((None, C, rows, 128), lambda b, v: (b, 0, v, 0)),
                pl.BlockSpec((None, 1, rows, 128), lambda b, v: (b, 0, v, 0)),
            ],
            out_specs=[out_spec, out_spec, out_spec],
        ),
        compiler_params=pltpu.CompilerParams(
            dimension_semantics=("parallel", "arbitrary"),
            vmem_limit_bytes=_vmem_limit(vmem_cap)),
        cost_estimate=cost,
    )(source4, target4)
    # Tiny final lane/sublane reduction in plain JAX (runs once).
    return (inter.sum(axis=(-2, -1)), svol.sum(axis=(-2, -1)),
            tvol.sum(axis=(-2, -1)))


def _dice_sums_dense(source4, target4, R):
    """Both inputs (B, C, R, 128); target is already one-hot / probabilities."""
    B, C = source4.shape[0], source4.shape[1]
    src_es = source4.dtype.itemsize
    tgt_es = target4.dtype.itemsize
    vmem_cap = _vmem_capacity_bytes()
    per_row = 128 * (2 * C * (src_es + tgt_es) + (3 * C + 2) * 4)
    rows = _pick_rows(R, per_row, vmem_cap)
    n_tiles = pl.cdiv(R, rows)
    ragged = (R % rows) != 0
    sub = 8 if (rows % 8 == 0 and rows >= 8) else 1

    def kernel(src_ref, tgt_ref, inter_ref, svol_ref, tvol_ref):
        v = pl.program_id(1)

        @pl.when(v == 0)
        def _init():
            inter_ref[...] = jnp.zeros_like(inter_ref)
            svol_ref[...] = jnp.zeros_like(svol_ref)
            tvol_ref[...] = jnp.zeros_like(tvol_ref)

        def accumulate(mask_rows):
            s = src_ref[...].astype(jnp.float32)               # (C, rows, 128)
            t = tgt_ref[...].astype(jnp.float32)               # (C, rows, 128)
            if mask_rows:
                ridx = lax.broadcasted_iota(jnp.int32, (1, rows, 128), 1)
                valid = (v * rows + ridx) < R
                s = jnp.where(valid, s, 0.0)
                t = jnp.where(valid, t, 0.0)
            if sub == 8:
                s4 = s.reshape(C, rows // 8, 8, 128)
                t4 = t.reshape(C, rows // 8, 8, 128)
                inter_ref[...] += jnp.sum(s4 * t4, axis=1)
                svol_ref[...] += jnp.sum(s4, axis=1)
                tvol_ref[...] += jnp.sum(t4, axis=1)
            else:
                inter_ref[...] += jnp.sum(s * t, axis=1, keepdims=True)
                svol_ref[...] += jnp.sum(s, axis=1, keepdims=True)
                tvol_ref[...] += jnp.sum(t, axis=1, keepdims=True)

        if ragged:
            @pl.when(v != n_tiles - 1)
            def _steady():
                accumulate(False)

            @pl.when(v == n_tiles - 1)
            def _tail():
                accumulate(True)
        else:
            accumulate(False)

    out_shape = tuple(jax.ShapeDtypeStruct((B, C, sub, 128), jnp.float32)
                      for _ in range(3))
    out_spec = pl.BlockSpec((None, C, sub, 128), lambda b, v: (b, 0, 0, 0))
    V = R * 128
    cost = pl.CostEstimate(
        flops=int(5 * B * C * V), transcendentals=0,
        bytes_accessed=int(B * C * V * (src_es + tgt_es)
                           + 3 * B * C * sub * 128 * 4))

    inter, svol, tvol = pl.pallas_call(
        kernel,
        out_shape=out_shape,
        grid_spec=pltpu.PrefetchScalarGridSpec(
            num_scalar_prefetch=0,
            grid=(B, n_tiles),
            in_specs=[
                pl.BlockSpec((None, C, rows, 128), lambda b, v: (b, 0, v, 0)),
                pl.BlockSpec((None, C, rows, 128), lambda b, v: (b, 0, v, 0)),
            ],
            out_specs=[out_spec, out_spec, out_spec],
        ),
        compiler_params=pltpu.CompilerParams(
            dimension_semantics=("parallel", "arbitrary"),
            vmem_limit_bytes=_vmem_limit(vmem_cap)),
        cost_estimate=cost,
    )(source4, target4)
    return (inter.sum(axis=(-2, -1)), svol.sum(axis=(-2, -1)),
            tvol.sum(axis=(-2, -1)))


# ---------------------------------------------------------------------------
# (B, C)-sized glue (weights / scores / log) — plain JAX
# ---------------------------------------------------------------------------
def _gdice_loss_from_sums(intersection, source_volume, target_volume,
                          weight_type, eps):
    B, C = intersection.shape
    if weight_type == 'Simple':
        weights = 1.0 / (target_volume.astype(jnp.float32) + eps)
    elif weight_type == 'Square':
        weights = 1.0 / (target_volume.astype(jnp.float32) ** 2 + eps)
    elif weight_type == 'Uniform':
        weights = jnp.ones((B, C), jnp.float32)
    else:
        raise ValueError(f'Class weighting type {weight_type} does not exist!')

    if weight_type in ('Simple', 'Square'):
        temp_weights = jnp.where(jnp.isinf(weights),
                                 jnp.ones_like(weights), weights)
        max_weights = temp_weights.max(axis=1, keepdims=True)
        weights = jnp.where(jnp.isinf(weights),
                            jnp.ones_like(weights) * max_weights, weights)

    weights = weights / weights.max()
    scores = ((2.0 * jnp.sum(intersection * weights, axis=1) + eps) /
              (jnp.sum(weights * (source_volume + target_volume), axis=1)
               + 2.0 * eps))
    return -jnp.log(scores.mean())


def log_generalized_dice_loss(source, target, n_class=None,
                              weight_type='Simple', eps=1e-10):
    """source: (B, C, D, M, N) probabilities / one-hot.
    target: (B, 1, D, M, N) integer mask OR (B, C, D, M, N) one-hot / probs.
    Returns scalar loss = -log(mean_b(generalized dice score_b))."""
    assert source.shape[0] == target.shape[0]
    assert source.shape[2:] == target.shape[2:]
    B, C = int(source.shape[0]), int(source.shape[1])
    V = 1
    for d in source.shape[2:]:
        V *= int(d)
    V128 = ((V + 127) // 128) * 128
    R = V128 // 128

    src_flat = source.reshape(B, C, V)

    if target.shape[1] == 1:
        # TODO(synk): PyTorch infers n_class from torch.unique(...) at runtime
        # (data-dependent); here the class count must equal C. Out-of-range /
        # non-integer labels match no class (same as the truncating one-hot).
        if n_class is not None and n_class != C:
            raise ValueError(
                f'n_class={n_class} must match source channels C={C}')
        tgt_flat = target.reshape(B, 1, V)
        if V128 != V:
            # TODO(synk): rare ragged tail (V % 128 != 0) pays one extra HBM
            # pass for zero/no-class padding.
            src_flat = jnp.pad(src_flat, ((0, 0), (0, 0), (0, V128 - V)))
            tgt_flat = jnp.pad(tgt_flat, ((0, 0), (0, 0), (0, V128 - V)),
                               constant_values=C)
        inter, svol, tvol = _dice_sums_mask(
            src_flat.reshape(B, C, R, 128),
            tgt_flat.reshape(B, 1, R, 128), R)
    elif target.shape[1] == C:
        tgt_flat = target.reshape(B, C, V)
        if V128 != V:
            src_flat = jnp.pad(src_flat, ((0, 0), (0, 0), (0, V128 - V)))
            tgt_flat = jnp.pad(tgt_flat, ((0, 0), (0, 0), (0, V128 - V)))
        inter, svol, tvol = _dice_sums_dense(
            src_flat.reshape(B, C, R, 128),
            tgt_flat.reshape(B, C, R, 128), R)
    else:
        raise ValueError(f'Incorrect size of target tensor: {target.shape}')

    # TODO(synk): on v7x with B == 1 only one TensorCore streams; a second
    # "parallel" grid axis splitting R would use both cores for small batch.
    return _gdice_loss_from_sums(inter, svol, tvol, weight_type, eps)


# ---------------------------------------------------------------------------
# Pure-JAX reference (for correctness check)
# ---------------------------------------------------------------------------
def _reference_loss(source, target, n_class, weight_type, eps):
    B, C = source.shape[0], source.shape[1]
    src = source.reshape(B, C, -1).astype(jnp.float32)
    if target.shape[1] == 1:
        t_idx = target.reshape(B, -1).astype(jnp.int32)
        tgt = jax.nn.one_hot(t_idx, n_class, axis=1, dtype=jnp.float32)
    else:
        tgt = target.reshape(B, C, -1).astype(jnp.float32)
    inter = (src * tgt).sum(-1)
    svol = src.sum(-1)
    tvol = tgt.sum(-1)
    return _gdice_loss_from_sums(inter, svol, tvol, weight_type, eps)


if __name__ == "__main__":
    key = jax.random.PRNGKey(0)
    k1, k2 = jax.random.split(key)

    # Small shapes consistent with the module: B x C x D x M x N
    B, C, D, M, N = 2, 4, 4, 8, 8
    logits = jax.random.normal(k1, (B, C, D, M, N), dtype=jnp.float32)
    source = jax.nn.softmax(logits, axis=1)                  # class-wise probs
    target = jax.random.randint(k2, (B, 1, D, M, N), 0, C).astype(jnp.float32)

    # --- integer-mask path (fused in-kernel one-hot) ---
    loss = log_generalized_dice_loss(source, target, n_class=C,
                                     weight_type='Simple')
    loss = jax.block_until_ready(loss)
    ref = _reference_loss(source, target, C, 'Simple', 1e-10)
    assert abs(float(loss) - float(ref)) <= 1e-4 * max(1.0, abs(float(ref))), \
        f'mask path mismatch: {float(loss)} vs {float(ref)}'

    # --- dense one-hot target path ---
    tgt_dense = jax.nn.one_hot(
        target.reshape(B, -1).astype(jnp.int32), C, axis=1,
        dtype=jnp.float32).reshape(B, C, D, M, N)
    loss2 = log_generalized_dice_loss(source, tgt_dense, weight_type='Square')
    loss2 = jax.block_until_ready(loss2)
    ref2 = _reference_loss(source, tgt_dense, C, 'Square', 1e-10)
    assert abs(float(loss2) - float(ref2)) <= 1e-4 * max(1.0, abs(float(ref2))), \
        f'dense path mismatch: {float(loss2)} vs {float(ref2)}'

    print("KERNEL_OK")
</pallas_src>

<mosaic_0001>
module attributes {stable_mosaic.version = 11 : i64} {
  func.func @kernel(%arg0: i32, %arg1: i32, %arg2: memref<1x4x2x128xf32, #tpu.memory_space<vmem>>, %arg3: memref<1x1x2x128xf32, #tpu.memory_space<vmem>>, %arg4: memref<1x4x1x128xf32, #tpu.memory_space<vmem>>, %arg5: memref<1x4x1x128xf32, #tpu.memory_space<vmem>>, %arg6: memref<1x4x1x128xf32, #tpu.memory_space<vmem>>) attributes {dimension_semantics = [#tpu.dimension_semantics<parallel>, #tpu.dimension_semantics<arbitrary>], iteration_bounds = array<i64: 2, 1>, scalar_prefetch = 0 : i64, scratch_operands = 0 : i64, tpu.core_type = #tpu.core_type<tc>, window_params = [{transform_indices = @transform_0, window_bounds = array<i64: 1, 4, 2, 128>}, {transform_indices = @transform_1, window_bounds = array<i64: 1, 1, 2, 128>}, {transform_indices = @transform_2, window_bounds = array<i64: 1, 4, 1, 128>}, {transform_indices = @transform_3, window_bounds = array<i64: 1, 4, 1, 128>}, {transform_indices = @transform_4, window_bounds = array<i64: 1, 4, 1, 128>}]} {
    %c0_i32 = arith.constant 0 : i32
    %0 = arith.cmpi eq, %arg1, %c0_i32 : i32
    %1 = arith.extui %0 : i1 to i32
    %c0_i32_0 = arith.constant 0 : i32
    %2 = arith.cmpi ne, %1, %c0_i32_0 : i32
    scf.if %2 {
      %cst_34 = arith.constant 0.000000e+00 : f32
      %38 = vector.broadcast %cst_34 : f32 to vector<4x1x128xf32>
      %c0_35 = arith.constant 0 : index
      %c0_36 = arith.constant 0 : index
      %c0_37 = arith.constant 0 : index
      %c0_38 = arith.constant 0 : index
      %39 = vector.load %arg4[%c0_35, %c0_36, %c0_37, %c0_38] : memref<1x4x1x128xf32, #tpu.memory_space<vmem>>, vector<1x4x1x128xf32>
      %40 = vector.shape_cast %39 : vector<1x4x1x128xf32> to vector<4x1x128xf32>
      %41 = vector.shape_cast %38 : vector<4x1x128xf32> to vector<1x4x1x128xf32>
      tpu.vector_store %arg4[%c0_35, %c0_36, %c0_37, %c0_38], %41 {strides = array<i32>} : memref<1x4x1x128xf32, #tpu.memory_space<vmem>>, vector<1x4x1x128xf32>,
      %cst_39 = arith.constant 0.000000e+00 : f32
      %42 = vector.broadcast %cst_39 : f32 to vector<4x1x128xf32>
      %c0_40 = arith.constant 0 : index
      %c0_41 = arith.constant 0 : index
      %c0_42 = arith.constant 0 : index
      %c0_43 = arith.constant 0 : index
      %43 = vector.load %arg5[%c0_40, %c0_41, %c0_42, %c0_43] : memref<1x4x1x128xf32, #tpu.memory_space<vmem>>, vector<1x4x1x128xf32>
      %44 = vector.shape_cast %43 : vector<1x4x1x128xf32> to vector<4x1x128xf32>
      %45 = vector.shape_cast %42 : vector<4x1x128xf32> to vector<1x4x1x128xf32>
      tpu.vector_store %arg5[%c0_40, %c0_41, %c0_42, %c0_43], %45 {strides = array<i32>} : memref<1x4x1x128xf32, #tpu.memory_space<vmem>>, vector<1x4x1x128xf32>,
      %cst_44 = arith.constant 0.000000e+00 : f32
      %46 = vector.broadcast %cst_44 : f32 to vector<4x1x128xf32>
      %c0_45 = arith.constant 0 : index
      %c0_46 = arith.constant 0 : index
      %c0_47 = arith.constant 0 : index
      %c0_48 = arith.constant 0 : index
      %47 = vector.load %arg6[%c0_45, %c0_46, %c0_47, %c0_48] : memref<1x4x1x128xf32, #tpu.memory_space<vmem>>, vector<1x4x1x128xf32>
      %48 = vector.shape_cast %47 : vector<1x4x1x128xf32> to vector<4x1x128xf32>
      %49 = vector.shape_cast %46 : vector<4x1x128xf32> to vector<1x4x1x128xf32>
      tpu.vector_store %arg6[%c0_45, %c0_46, %c0_47, %c0_48], %49 {strides = array<i32>} : memref<1x4x1x128xf32, #tpu.memory_space<vmem>>, vector<1x4x1x128xf32>,
    } else {
    }
    %c0 = arith.constant 0 : index
    %c0_1 = arith.constant 0 : index
    %c0_2 = arith.constant 0 : index
    %c0_3 = arith.constant 0 : index
    %3 = vector.load %arg2[%c0, %c0_1, %c0_2, %c0_3] : memref<1x4x2x128xf32, #tpu.memory_space<vmem>>, vector<1x4x2x128xf32>
    %4 = vector.shape_cast %3 : vector<1x4x2x128xf32> to vector<4x2x128xf32>
    %c0_4 = arith.constant 0 : index
    %c0_5 = arith.constant 0 : index
    %c0_6 = arith.constant 0 : index
    %c0_7 = arith.constant 0 : index
    %5 = vector.load %arg3[%c0_4, %c0_5, %c0_6, %c0_7] : memref<1x1x2x128xf32, #tpu.memory_space<vmem>>, vector<1x1x2x128xf32>
    %6 = vector.shape_cast %5 : vector<1x1x2x128xf32> to vector<1x2x128xf32>
    %7 = arith.fptosi %6 : vector<1x2x128xf32> to vector<1x2x128xi32>
    %8 = tpu.iota {dimensions = array<i32: 0>} : vector<4x2x128xi32>
    %9 = vector.broadcast %7 : vector<1x2x128xi32> to vector<4x2x128xi32>
    %10 = arith.cmpi eq, %9, %8 : vector<4x2x128xi32>
    %11 = arith.extui %10 : vector<4x2x128xi1> to vector<4x2x128xi32>
    %12 = arith.sitofp %11 : vector<4x2x128xi32> to vector<4x2x128xf32>
    %c0_8 = arith.constant 0 : index
    %c0_9 = arith.constant 0 : index
    %c0_10 = arith.constant 0 : index
    %c0_11 = arith.constant 0 : index
    %13 = vector.load %arg4[%c0_8, %c0_9, %c0_10, %c0_11] : memref<1x4x1x128xf32, #tpu.memory_space<vmem>>, vector<1x4x1x128xf32>
    %14 = vector.shape_cast %13 : vector<1x4x1x128xf32> to vector<4x1x128xf32>
    %15 = arith.mulf %4, %12 : vector<4x2x128xf32>
    %cst = arith.constant dense<0.000000e+00> : vector<4x128xf32>
    %16 = vector.multi_reduction <add>, %15, %cst [1] : vector<4x2x128xf32> to vector<4x128xf32>
    %17 = vector.shape_cast %16 : vector<4x128xf32> to vector<4x1x128xf32>
    %18 = arith.addf %14, %17 : vector<4x1x128xf32>
    %c0_12 = arith.constant 0 : index
    %c0_13 = arith.constant 0 : index
    %c0_14 = arith.constant 0 : index
    %c0_15 = arith.constant 0 : index
    %19 = vector.load %arg4[%c0_12, %c0_13, %c0_14, %c0_15] : memref<1x4x1x128xf32, #tpu.memory_space<vmem>>, vector<1x4x1x128xf32>
    %20 = vector.shape_cast %19 : vector<1x4x1x128xf32> to vector<4x1x128xf32>
    %21 = vector.shape_cast %18 : vector<4x1x128xf32> to vector<1x4x1x128xf32>
    tpu.vector_store %arg4[%c0_12, %c0_13, %c0_14, %c0_15], %21 {strides = array<i32>} : memref<1x4x1x128xf32, #tpu.memory_space<vmem>>, vector<1x4x1x128xf32>,
    %c0_16 = arith.constant 0 : index
    %c0_17 = arith.constant 0 : index
    %c0_18 = arith.constant 0 : index
    %c0_19 = arith.constant 0 : index
    %22 = vector.load %arg5[%c0_16, %c0_17, %c0_18, %c0_19] : memref<1x4x1x128xf32, #tpu.memory_space<vmem>>, vector<1x4x1x128xf32>
    %23 = vector.shape_cast %22 : vector<1x4x1x128xf32> to vector<4x1x128xf32>
    %cst_20 = arith.constant dense<0.000000e+00> : vector<4x128xf32>
    %24 = vector.multi_reduction <add>, %4, %cst_20 [1] : vector<4x2x128xf32> to vector<4x128xf32>
    %25 = vector.shape_cast %24 : vector<4x128xf32> to vector<4x1x128xf32>
    %26 = arith.addf %23, %25 : vector<4x1x128xf32>
    %c0_21 = arith.constant 0 : index
    %c0_22 = arith.constant 0 : index
    %c0_23 = arith.constant 0 : index
    %c0_24 = arith.constant 0 : index
    %27 = vector.load %arg5[%c0_21, %c0_22, %c0_23, %c0_24] : memref<1x4x1x128xf32, #tpu.memory_space<vmem>>, vector<1x4x1x128xf32>
    %28 = vector.shape_cast %27 : vector<1x4x1x128xf32> to vector<4x1x128xf32>
    %29 = vector.shape_cast %26 : vector<4x1x128xf32> to vector<1x4x1x128xf32>
    tpu.vector_store %arg5[%c0_21, %c0_22, %c0_23, %c0_24], %29 {strides = array<i32>} : memref<1x4x1x128xf32, #tpu.memory_space<vmem>>, vector<1x4x1x128xf32>,
    %c0_25 = arith.constant 0 : index
    %c0_26 = arith.constant 0 : index
    %c0_27 = arith.constant 0 : index
    %c0_28 = arith.constant 0 : index
    %30 = vector.load %arg6[%c0_25, %c0_26, %c0_27, %c0_28] : memref<1x4x1x128xf32, #tpu.memory_space<vmem>>, vector<1x4x1x128xf32>
    %31 = vector.shape_cast %30 : vector<1x4x1x128xf32> to vector<4x1x128xf32>
    %cst_29 = arith.constant dense<0.000000e+00> : vector<4x128xf32>
    %32 = vector.multi_reduction <add>, %12, %cst_29 [1] : vector<4x2x128xf32> to vector<4x128xf32>
    %33 = vector.shape_cast %32 : vector<4x128xf32> to vector<4x1x128xf32>
    %34 = arith.addf %31, %33 : vector<4x1x128xf32>
    %c0_30 = arith.constant 0 : index
    %c0_31 = arith.constant 0 : index
    %c0_32 = arith.constant 0 : index
    %c0_33 = arith.constant 0 : index
    %35 = vector.load %arg6[%c0_30, %c0_31, %c0_32, %c0_33] : memref<1x4x1x128xf32, #tpu.memory_space<vmem>>, vector<1x4x1x128xf32>
    %36 = vector.shape_cast %35 : vector<1x4x1x128xf32> to vector<4x1x128xf32>
    %37 = vector.shape_cast %34 : vector<4x1x128xf32> to vector<1x4x1x128xf32>
    tpu.vector_store %arg6[%c0_30, %c0_31, %c0_32, %c0_33], %37 {strides = array<i32>} : memref<1x4x1x128xf32, #tpu.memory_space<vmem>>, vector<1x4x1x128xf32>,
    return
  }
  func.func @transform_0(%arg0: i32, %arg1: i32) -> (i32, i32, i32, i32) {
    %c0_i32 = arith.constant 0 : i32
    %c0_i32_0 = arith.constant 0 : i32
    %c0_i32_1 = arith.constant 0 : i32
    return %arg0, %c0_i32, %arg1, %c0_i32_0 : i32, i32, i32, i32
  }
  func.func @transform_1(%arg0: i32, %arg1: i32) -> (i32, i32, i32, i32) {
    %c0_i32 = arith.constant 0 : i32
    %c0_i32_0 = arith.constant 0 : i32
    %c0_i32_1 = arith.constant 0 : i32
    return %arg0, %c0_i32, %arg1, %c0_i32_0 : i32, i32, i32, i32
  }
  func.func @transform_2(%arg0: i32, %arg1: i32) -> (i32, i32, i32, i32) {
    %c0_i32 = arith.constant 0 : i32
    %c0_i32_0 = arith.constant 0 : i32
    %c0_i32_1 = arith.constant 0 : i32
    %c0_i32_2 = arith.constant 0 : i32
    return %arg0, %c0_i32, %c0_i32_0, %c0_i32_1 : i32, i32, i32, i32
  }
  func.func @transform_3(%arg0: i32, %arg1: i32) -> (i32, i32, i32, i32) {
    %c0_i32 = arith.constant 0 : i32
    %c0_i32_0 = arith.constant 0 : i32
    %c0_i32_1 = arith.constant 0 : i32
    %c0_i32_2 = arith.constant 0 : i32
    return %arg0, %c0_i32, %c0_i32_0, %c0_i32_1 : i32, i32, i32, i32
  }
  func.func @transform_4(%arg0: i32, %arg1: i32) -> (i32, i32, i32, i32) {
    %c0_i32 = arith.constant 0 : i32
    %c0_i32_0 = arith.constant 0 : i32
    %c0_i32_1 = arith.constant 0 : i32
    %c0_i32_2 = arith.constant 0 : i32
    return %arg0, %c0_i32, %c0_i32_0, %c0_i32_1 : i32, i32, i32, i32
  }
}

</mosaic_0001>

<bundles_post_ra>
// kernel: tpu_custom_call.1
= control target key start
LH: loop header
LB: loop body
LE: loop exit
PB: predicated region body
PF: predicated region fallthrough
CT: control target
= control target key end

     0   :  { %s1422_s0 = inlined_call_operand.hbm [shape: f32[2,4,2,128], index: 0, kind: input, shape index: {}]   ;;  %s1423_s1 = inlined_call_operand.hbm [shape: f32[2,1,2,128], index: 1, kind: input, shape index: {}]   ;;  %s1424_s2 = inlined_call_operand.hbm [shape: f32[2,4,1,128], index: 2, kind: output, shape index: {0}]   ;;  %s1425_s3 = inlined_call_operand.hbm [shape: f32[2,4,1,128], index: 3, kind: output, shape index: {1}]   ;;  %s1426_s4 = inlined_call_operand.hbm [shape: f32[2,4,1,128], index: 4, kind: output, shape index: {2}]  }
   0x1   :  { %1430 = sst [smem:[#allocation15_spill]] %s1422_s0 }
   0x2   :  { %10 = vsyncpa [#allocation3], 0 }
   0x3   :  { %12 = vsyncpa [#allocation3 + $0x1], 0 }
   0x4   :  { %13 = vsyncpa [#allocation6], 0 }
   0x5   :  { %15 = vsyncpa [#allocation6 + $0x1], 0 }
   0x6   :  { %16 = vsyncpa [#allocation4], 0 }
   0x7   :  { %18 = vsyncpa [#allocation4 + $0x1], 0 }
   0x8   :  { %19 = vsyncpa [#allocation9], 0 }
   0x9   :  { %21 = vsyncpa [#allocation9 + $0x1], 0  ;;  %s1033_s15 = smov 0   ;;  %s1035_s16 = smov 0  }
   0xa   :  { %s1037_s17 = smov 0   ;;  %s1039_s18 = smov 0  }
   0xb   :  { %s1041_s19 = smov 0   ;;  %s1043_s20 = smov 0  }
   0xc LB: > { %s1064_s21 = sadd.s32 4294967295, %s996_s20   ;;  %s1428_s22 = sadd.s32 4294967294, %s996_s20   ;;  %s996_s20 = sphi %s1043_s20, %s27_s20   ;;  %s992_s19 = sphi %s1041_s19, %s1449_s19   ;;  %s988_s18 = sphi %s1039_s18, %s1448_s18   ;;  %s984_s17 = sphi %s1037_s17, %s1447_s17   ;;  %s980_s16 = sphi %s1035_s16, %s1446_s16   ;;  %s976_s15 = sphi %s1033_s15, %s1445_s15  }
   0xd   : > { %s39_s23 = sadd.s32 1, %s992_s19  ;;  %s48_s24 = sadd.s32 1, %s984_s17 }
   0xe   : > { %p41_p0 = scmp.ge.s32.totalorder %s39_s23, 2  ;;  %p55_p1 = scmp.ne.s32.totalorder %s984_s17, %s980_s16 }
   0xf   : > { %p56_p2 = scmp.eq.s32.totalorder %s996_s20, 0  ;;  %p61_p3 = scmp.ne.s32.totalorder %s980_s16, %s976_s15 }
  0x10   : > { %s1451_s23 = smov (%p41_p0, %s39_s23), 0  ;;  %p62_p5 = scmp.eq.s32.totalorder %s1064_s21, 0 }
  0x11   : > { %p1076_p4 = por %p56_p2, %p55_p1  ;;  %s43_s26 = ssub.s32 %s992_s19, %s1451_s23 }
  0x12   : > { %p113_p6 = scmp.eq.s32.totalorder %s1064_s21, 1  ;;  %p46_p7 = scmp.eq.s32.totalorder %s43_s26, 0 }
  0x13   : > { %p1084_p8 = por %p62_p5, %p61_p3  ;;  %p119_p10 = scmp.eq.s32.totalorder %s1428_s22, 1 }
  0x14   : > { %p1088_p9 = por %p113_p6, %p55_p1  ;;  %p735_p13 = scmp.lt.s32.totalorder %s996_s20, 2 }
  0x15   : > { %s1432_s27 = scalar_select %p1084_p8, 1, 0 }
  0x16   : > { %s1433_s28 = scalar_select %p1088_p9, 1, 0 }
  0x17   : > { %s1095_s29 = scalar_select %p46_p7, %s984_s17, %s48_s24  }
  0x18   : > { %p1097_p11 = por %p119_p10, %p61_p3  ;;  %s1104_s5 = sand.u32 1, %s984_s17  }
  0x19   : > { %s676_s6 = sshll.u32 %s1104_s5, 3  ;;  %s702_s7 = sshll.u32 %s992_s19, 7 }
  0x1a   : > { %s1434_s30 = scalar_select %p1097_p11, 1, 0 }
  0x1b   : > { %s1435_s0 = sld [smem:[#allocation15_spill]]  ;;  %s195_s11 = scalar_lea.vmem [#allocation2], %s676_s6 }
  0x1c   : > { %s203_s12 = sshll.u32 %s195_s11, 4  ;;  %p1117_p0 = pnand %p735_p13, %p1076_p4  ;;  %s1113_s12 = int_to_ptr.vmem [resolvable:$true] %s203_s12 }
  0x1d   : > { %s192_s14 = scalar_lea.sflag [#allocation3], %s1104_s5 }
  0x1e   : > { %p792_p3 = pneg %p1117_p0 }
  0x21   : > { %s1111_s10 = scalar_lea.hbm %s1435_s0, %s702_s7  ;;  %s795_s25 = scalar_lea.hbm %s1435_s0, 256 }
  0x22   : > { %s790_s24 = scalar_lea.hbm %s1111_s10, 128  ;;  %p796_p4 = scmp.lt.u32.totalorder %s1111_s10, %s1435_s0 }
  0x23   : > { %p791_p2 = scmp.ne.s32.totalorder %s1111_s10, %s790_s24  ;;  %p797_p7 = scmp.lt.u32.totalorder %s795_s25, %s790_s24 }
  0x24   : > { %p799_p13 = scmp.lt.u32.totalorder %s790_s24, %s1111_s10 }
  0x25   : > { %p793_p5 = pnand %p792_p3, %p791_p2  ;;  %p798_p10 = por %p797_p7, %p796_p4 }
  0x27   : > { %p794_p6 = pneg %p793_p5  ;;  %p800_p12 = por %p799_p13, %p798_p10 }
  0x29   : > { %p801_p1 = pnand %p800_p12, %p794_p6 }
  0x2b   : > { %804 = shalt.err (!%p801_p1)
}
  0x2c   : > { %s805_s9 = scalar_lea.vmem %s1113_s12, 128  ;;  %s998_s11 = smov [#allocation2]  }
  0x2d   : > { %p806_p2 = scmp.ne.s32.totalorder %s1113_s12, %s805_s9  ;;  %s810_s26 = sshll.u32 %s998_s11, 4  ;;  %s811_s26 = int_to_ptr.vmem [resolvable:$false] %s810_s26 }
  0x2e   : > { %s812_s6 = scalar_lea.vmem %s811_s26, 256  ;;  %p813_p9 = scmp.lt.s32.totalorder %s1113_s12, %s811_s26 }
  0x2f   : > { %p808_p5 = pnand %p806_p2, %p792_p3  ;;  %p814_p4 = scmp.lt.s32.totalorder %s812_s6, %s805_s9 }
  0x31   : > { %p809_p11 = pneg %p808_p5  ;;  %p815_p7 = por %p814_p4, %p813_p9 }
  0x33   : > { %p816_p10 = pnand %p815_p7, %p809_p11 }
  0x35   : > { %819 = shalt.err (!%p816_p10)
}
  0x36   : > { %s999_s24 = smov 32   ;;  %s1000_s25 = smov 2  }
  0x37   : > { %721 = dma.hbm_to_vmem [thread:$0]  (!%p1117_p0), %s1111_s10, 128, %s1113_s12, %s192_s14, %s999_s24, %s999_s24, %s1000_s25  }
  0x38   : > { %p230_p12 = scmp.lt.s32.totalorder %s996_s20, 3  ;;  %s679_s7 = sshll.u32 %s1104_s5, 1 }
  0x39   : > { %s680_s8 = sshll.u32 %s992_s19, 5  ;;  %p1437_p9 = scmp.ge.s32.totalorder %s996_s20, 1 }
  0x3a   : > { %s1162_s6 = scalar_lea.hbm %s1423_s1, %s680_s8  ;;  %s217_s22 = scalar_lea.vmem [#allocation5], %s679_s7 }
  0x3b   : > { %p1155_p11 = pnand %p1437_p9, %p230_p12  ;;  %s225_s0 = sshll.u32 %s217_s22, 4  ;;  %s226_s0 = int_to_ptr.vmem [resolvable:$true] %s225_s0 }
  0x3c   : > { %s214_s10 = scalar_lea.sflag [#allocation6], %s1104_s5  ;;  %s820_s12 = scalar_lea.hbm %s1162_s6, 32 }
  0x3d   : > { %s1438_s9 = scalar_select %p1155_p11, 1, 0 }
  0x3e   : > { %p821_p1 = scmp.ne.s32.totalorder %s1162_s6, %s820_s12  ;;  %s825_s25 = scalar_lea.hbm %s1423_s1, 64 }
  0x3f   : > { %p826_p2 = scmp.lt.u32.totalorder %s1162_s6, %s1423_s1  ;;  %p827_p5 = scmp.lt.u32.totalorder %s825_s25, %s820_s12 }
  0x40   : > { %p823_p6 = pnand %p821_p1, %p792_p3  ;;  %p829_p7 = scmp.lt.u32.totalorder %s820_s12, %s1162_s6 }
  0x41   : > { %p828_p4 = por %p827_p5, %p826_p2 }
  0x42   : > { %p824_p13 = pneg %p823_p6 }
  0x43   : > { %p830_p10 = por %p829_p7, %p828_p4 }
  0x45   : > { %p831_p12 = pnand %p830_p10, %p824_p13 }
  0x47   : > { %834 = shalt.err (!%p831_p12)
}
  0x48   : > { %s835_s22 = scalar_lea.vmem %s226_s0, 32  ;;  %s1001_s5 = smov [#allocation5]  }
  0x49   : > { %p836_p9 = scmp.ne.s32.totalorder %s226_s0, %s835_s22  ;;  %s840_s7 = sshll.u32 %s1001_s5, 4  ;;  %s841_s7 = int_to_ptr.vmem [resolvable:$false] %s840_s7 }
  0x4a   : > { %s842_s26 = scalar_lea.vmem %s841_s7, 64  ;;  %p843_p8 = scmp.lt.s32.totalorder %s226_s0, %s841_s7 }
  0x4b   : > { %p838_p1 = pnand %p836_p9, %p792_p3  ;;  %p844_p11 = scmp.lt.s32.totalorder %s842_s26, %s835_s22 }
  0x4d   : > { %p839_p6 = pneg %p838_p1  ;;  %p845_p2 = por %p844_p11, %p843_p8 }
  0x4f   : > { %p846_p5 = pnand %p845_p2, %p839_p6 }
  0x51   : > { %849 = shalt.err (!%p846_p5)
}
  0x52   : > { %724 = dma.hbm_to_vmem [thread:$0]  (!%p1117_p0), %s1162_s6, 32, %s226_s0, %s214_s10  }
  0x53   : > { %p1439_p13 = scmp.ne.s32.totalorder %s1438_s9, 0 }
  0x54   : > { %s1187_s12 = sand.u32 (!%p1439_p13), 1, %s980_s16   ;;  %p1440_p8 = scmp.ne.s32.totalorder (!%p1439_p13), %s1432_s27, 0 }
  0x55   : > { %234 = sbr.rel (%p1439_p13) target bundleno = 181 (0xb5), region = 28  ;;  %s682_s14 = sshll.u32 (!%p1439_p13), %s1187_s12, 3 }
  0x56   : > { %s237_s24 = scalar_lea.sflag (!%p1439_p13), [#allocation3], %s1187_s12  ;;  %s1191_s25 = scalar_lea.vmem (!%p1439_p13), [#allocation2], %s682_s14 }
  0x5c   : > { %959 = dma.done.wait (%p1440_p8), %s237_s24, 128  }
  0x5d   : > { %961 = vsyncadd (%p1440_p8), %s237_s24, 4294967168  ;;  %s683_s0 = sshll.u32 %s1187_s12, 1  ;;  %s246_s13 = scalar_lea.sflag [#allocation6], %s1187_s12 }
  0x5e   : > { %s1199_s9 = scalar_lea.vmem [#allocation5], %s683_s0 }
  0x5f   : > { %963 = dma.done.wait (%p1440_p8), %s246_s13, 32  }
  0x60   : > { %965 = vsyncadd (%p1440_p8), %s246_s13, 4294967264  ;;  %s684_s6 = sshll.u32 %s1187_s12, 2  ;;  %v1002_v0 = vmov 0.0   ;;  %vm331_vm0 = vcmask 1041408   ;;  %v305_v1 = vld [vmem:[%s1191_s25] sm:$0x3] }
  0x61   : > { %s1206_s10 = scalar_lea.vmem [#allocation8], %s684_s6  ;;  %s1216_s27 = scalar_lea.vmem [#allocation7], %s684_s6  ;;  %v306_v2 = vld [vmem:[%s1191_s25 + $0x2] sm:$0x3]  ;;  %v307_v3 = vld [vmem:[%s1191_s25 + $0x4] sm:$0x3] }
  0x62   : > { %297 = vst [vmem:[%s1206_s10] sm:$0x1] %v1002_v0  ;;  %298 = vst [vmem:[%s1206_s10 + $0x1] sm:$0x1] %v1002_v0  ;;  %s1226_s8 = scalar_lea.vmem [#allocation10], %s684_s6  ;;  %v372_v4 = vsel %vm331_vm0, %v305_v1, 0.0  ;;  %v379_v5 = vsel %vm331_vm0, %v306_v2, 0.0 }
  0x63   : > { %299 = vst [vmem:[%s1206_s10 + $0x2] sm:$0x1] %v1002_v0  ;;  %300 = vst [vmem:[%s1206_s10 + $0x3] sm:$0x1] %v1002_v0  ;;  %v386_v6 = vsel %vm331_vm0, %v307_v3, 0.0  ;;  %v373_v8 = vrot.slane %v372_v4, 4 }
  0x64   : > { %293 = vst [vmem:[%s1216_s27] sm:$0x1] %v1002_v0  ;;  %294 = vst [vmem:[%s1216_s27 + $0x1] sm:$0x1] %v1002_v0  ;;  %v1243_v7 = vld [vmem:[%s1191_s25 + $0x6] sm:$0x3]  ;;  %v380_v9 = vrot.slane %v379_v5, 4 }
  0x65   : > { %295 = vst [vmem:[%s1216_s27 + $0x2] sm:$0x1] %v1002_v0  ;;  %296 = vst [vmem:[%s1216_s27 + $0x3] sm:$0x1] %v1002_v0  ;;  %v387_v10 = vrot.slane %v386_v6, 4  ;;  %v393_v11 = vsel %vm331_vm0, %v1243_v7, 0.0  ;;  %v374_v12 = vadd.f32 %v373_v8, %v372_v4 }
  0x66   : > { %301 = vst [vmem:[%s1226_s8] sm:$0x1] %v1002_v0  ;;  %302 = vst [vmem:[%s1226_s8 + $0x1] sm:$0x1] %v1002_v0  ;;  %v381_v13 = vadd.f32 %v380_v9, %v379_v5  ;;  %v394_v14 = vrot.slane %v393_v11, 4  ;;  %v309_v15 = vld [vmem:[%s1199_s9] sm:$0x3] }
  0x67   : > { %303 = vst [vmem:[%s1226_s8 + $0x2] sm:$0x1] %v1002_v0  ;;  %304 = vst [vmem:[%s1226_s8 + $0x3] sm:$0x1] %v1002_v0  ;;  %v388_v16 = vadd.f32 %v387_v10, %v386_v6  ;;  %v706_v17 = vtrunc.f32 %v309_v15  ;;  %v375_v18 = vrot.slane %v374_v12, 2  ;;  %s453_s11 = sand.u32 1, %s1064_s21  }
  0x68   : > { %v382_v19 = vrot.slane %v381_v13, 2  ;;  %v395_v20 = vadd.f32 %v394_v14, %v393_v11  ;;  %s1258_s22 = sshll.u32 %s988_s18, 6  ;;  %s488_s5 = sshll.u32 %s1206_s10, 4  ;;  %s1272_s5 = int_to_ptr.vmem [resolvable:$true] %s488_s5 }
  0x69   : > { %v389_v21 = vrot.slane %v388_v16, 2  ;;  %v707_v22 = vcvt.f32.s32 %v706_v17  ;;  %v376_v23 = vadd.f32 %v375_v18, %v374_v12  ;;  %v368_v27 = vld [vmem:[%s1206_s10] sm:$0x1]  ;;  %v369_v32 = vld [vmem:[%s1206_s10 + $0x1] sm:$0x1]  ;;  %s1270_s26 = scalar_lea.hbm %s1425_s3, %s1258_s22  ;;  %s1284_s14 = scalar_lea.sflag [#allocation9], %s453_s11 }
  0x6a   : > { %v383_v24 = vadd.f32 %v382_v19, %v381_v13  ;;  %v396_v25 = vrot.slane %v395_v20, 2  ;;  %v370_v39 = vld [vmem:[%s1206_s10 + $0x2] sm:$0x1]  ;;  %v371_v43 = vld [vmem:[%s1206_s10 + $0x3] sm:$0x1]  ;;  %s850_s24 = scalar_lea.vmem %s1272_s5, 64 }
  0x6b   : > { %v390_v26 = vadd.f32 %v389_v21, %v388_v16  ;;  %vm311_vm1 = vcmp.eq.s32.totalorder %v707_v22, 0  ;;  %vm312_vm2 = vcmp.eq.s32.totalorder %v707_v22, 1  ;;  %vm313_vm3 = vcmp.eq.s32.totalorder %v707_v22, 2  ;;  %p851_p0 = scmp.ne.s32.totalorder %s1272_s5, %s850_s24  ;;  %p1441_p3 = scmp.ne.s32.totalorder %s1433_s28, 0 }
  0x6c   : > { %v377_v28 = vrot.slane %v376_v23, 1  ;;  %v384_v29 = vrot.slane %v383_v24, 1  ;;  %v397_v30 = vadd.f32 %v396_v25, %v395_v20  ;;  %v687_v31 = vsel %vm311_vm1, 1.0, %v1002_v0  ;;  %s1003_s25 = smov [#allocation8]  }
  0x6d   : > { %v391_v33 = vrot.slane %v390_v26, 1  ;;  %v327_v34 = vmul.f32 %v687_v31, %v305_v1  ;;  %v688_v35 = vsel %vm312_vm2, 1.0, %v1002_v0  ;;  %v689_v36 = vsel %vm313_vm3, 1.0, %v1002_v0  ;;  %p852_p11 = pnand %p851_p0, %p1441_p3  ;;  %s854_s0 = sshll.u32 %s1003_s25, 4  ;;  %s855_s0 = int_to_ptr.vmem [resolvable:$false] %s854_s0 }
  0x6e   : > { %v378_v37 = vadd.f32 %v377_v28, %v376_v23  ;;  %v385_v38 = vadd.f32 %v384_v29, %v383_v24  ;;  %v398_v40 = vrot.slane %v397_v30, 1  ;;  %v328_v41 = vmul.f32 %v688_v35, %v306_v2  ;;  %s856_s13 = scalar_lea.vmem %s855_s0, 128  ;;  %p857_p7 = scmp.lt.s32.totalorder %s1272_s5, %s855_s0 }
  0x6f   : > { %v392_v42 = vadd.f32 %v391_v33, %v390_v26  ;;  %v332_v44 = vsel %vm331_vm0, %v327_v34, 0.0  ;;  %v329_v45 = vmul.f32 %v689_v36, %v307_v3  ;;  %vm314_vm4 = vcmp.eq.s32.totalorder %v707_v22, 3  ;;  %p853_p4 = pneg %p852_p11  ;;  %p858_p10 = scmp.lt.s32.totalorder %s856_s13, %s850_s24 }
  0x70   : > { %v400_v46 = vadd.f32 %v378_v37, %v368_v27  ;;  %v401_v47 = vadd.f32 %v385_v38, %v369_v32  ;;  %v399_v48 = vadd.f32 %v398_v40, %v397_v30  ;;  %v333_v49 = vrot.slane %v332_v44, 4 }
  0x71   : > { %v402_v50 = vadd.f32 %v392_v42, %v370_v39  ;;  %v339_v51 = vsel %vm331_vm0, %v328_v41, 0.0  ;;  %v346_v52 = vsel %vm331_vm0, %v329_v45, 0.0  ;;  %v690_v53 = vsel %vm314_vm4, 1.0, %v1002_v0  ;;  %p859_p12 = por %p858_p10, %p857_p7 }
  0x72   : > { %404 = vst [vmem:[%s1206_s10] sm:$0x1] %v400_v46  ;;  %405 = vst [vmem:[%s1206_s10 + $0x1] sm:$0x1] %v401_v47  ;;  %v403_v54 = vadd.f32 %v399_v48, %v371_v43  ;;  %v334_v55 = vadd.f32 %v333_v49, %v332_v44  ;;  %v340_v56 = vrot.slane %v339_v51, 4  ;;  %v347_v57 = vrot.slane %v346_v52, 4 }
  0x73   : > { %406 = vst [vmem:[%s1206_s10 + $0x2] sm:$0x1] %v402_v50  ;;  %v330_v58 = vmul.f32 %v690_v53, %v1243_v7  ;;  %v412_v59 = vsel %vm331_vm0, %v687_v31, 0.0  ;;  %v419_v60 = vsel %vm331_vm0, %v688_v35, 0.0  ;;  %v426_v61 = vsel %vm331_vm0, %v689_v36, 0.0  ;;  %p860_p9 = pnand %p859_p12, %p853_p4 }
  0x74   : > { %407 = vst [vmem:[%s1206_s10 + $0x3] sm:$0x1] %v403_v54  ;;  %v335_v62 = vrot.slane %v334_v55, 2  ;;  %v341_v63 = vadd.f32 %v340_v56, %v339_v51  ;;  %v348_v0 = vadd.f32 %v347_v57, %v346_v52  ;;  %v413_v1 = vrot.slane %v412_v59, 4 }
  0x75   : > { %v353_v2 = vsel %vm331_vm0, %v330_v58, 0.0  ;;  %v420_v3 = vrot.slane %v419_v60, 4  ;;  %v427_v4 = vrot.slane %v426_v61, 4  ;;  %v433_v5 = vsel %vm331_vm0, %v690_v53, 0.0 }
  0x76   : > { %863 = shalt.err (!%p860_p9)
}
  0x77   : > { %s864_s21 = scalar_lea.hbm %s1270_s26, 64  ;;  %s868_s10 = scalar_lea.hbm %s1425_s3, 128 }
  0x78   : > { %p865_p1 = scmp.ne.s32.totalorder %s1270_s26, %s864_s21  ;;  %p869_p5 = scmp.lt.u32.totalorder %s1270_s26, %s1425_s3 }
  0x79   : > { %p870_p13 = scmp.lt.u32.totalorder %s868_s10, %s864_s21  ;;  %p872_p0 = scmp.lt.u32.totalorder %s864_s21, %s1270_s26 }
  0x7a   : > { %p866_p6 = pnand %p865_p1, %p1441_p3 }
  0x7b   : > { %p871_p8 = por %p870_p13, %p869_p5 }
  0x7c   : > { %p867_p2 = pneg %p866_p6 }
  0x7d   : > { %p873_p11 = por %p872_p0, %p871_p8 }
  0x7f   : > { %p874_p4 = pnand %p873_p11, %p867_p2 }
  0x81   : > { %877 = shalt.err (!%p874_p4)
}
  0x82   : > { %s1004_s7 = smov 16   ;;  %s1005_s24 = smov 1   ;;  %v336_v6 = vadd.f32 %v335_v62, %v334_v55  ;;  %v342_v7 = vrot.slane %v341_v63, 2  ;;  %v349_v8 = vrot.slane %v348_v0, 2  ;;  %v354_v9 = vrot.slane %v353_v2, 4 }
  0x83   : > { %713 = dma.vmem_to_hbm [thread:$0]  (%p1441_p3), %s1272_s5, 64, %s1270_s26, %s1284_s14, %s1004_s7, %s1004_s7, %s1005_s24   ;;  %v414_v10 = vadd.f32 %v413_v1, %v412_v59  ;;  %v421_v11 = vadd.f32 %v420_v3, %v419_v60  ;;  %v428_v12 = vadd.f32 %v427_v4, %v426_v61  ;;  %v434_v13 = vrot.slane %v433_v5, 4 }
  0x84   : > { %v337_v14 = vrot.slane %v336_v6, 1  ;;  %v343_v15 = vadd.f32 %v342_v7, %v341_v63  ;;  %v350_v16 = vadd.f32 %v349_v8, %v348_v0  ;;  %v355_v17 = vadd.f32 %v354_v9, %v353_v2  ;;  %v323_v18 = vld [vmem:[%s1216_s27] sm:$0x1]  ;;  %v324_v27 = vld [vmem:[%s1216_s27 + $0x1] sm:$0x1]  ;;  %s472_s5 = sshll.u32 %s1216_s27, 4  ;;  %s1328_s13 = scalar_lea.hbm %s1424_s2, %s1258_s22  ;;  %s1330_s5 = int_to_ptr.vmem [resolvable:$true] %s472_s5 }
  0x85   : > { %v415_v19 = vrot.slane %v414_v10, 2  ;;  %v422_v20 = vrot.slane %v421_v11, 2  ;;  %v429_v21 = vrot.slane %v428_v12, 2  ;;  %v435_v22 = vadd.f32 %v434_v13, %v433_v5  ;;  %v325_v28 = vld [vmem:[%s1216_s27 + $0x2] sm:$0x1]  ;;  %s504_s26 = sshll.u32 %s1226_s8, 4  ;;  %s1339_s6 = scalar_lea.hbm %s1426_s4, %s1258_s22  ;;  %s1341_s26 = int_to_ptr.vmem [resolvable:$true] %s504_s26 }
  0x86   : > { %v338_v23 = vadd.f32 %v337_v14, %v336_v6  ;;  %v344_v24 = vrot.slane %v343_v15, 1  ;;  %v351_v25 = vrot.slane %v350_v16, 1  ;;  %v356_v26 = vrot.slane %v355_v17, 2  ;;  %v408_v37 = vld [vmem:[%s1226_s8] sm:$0x1]  ;;  %s449_s10 = scalar_lea.sflag [#allocation4], %s1187_s12 }
  0x87   : > { %v416_v29 = vadd.f32 %v415_v19, %v414_v10  ;;  %v423_v30 = vadd.f32 %v422_v20, %v421_v11  ;;  %v430_v31 = vadd.f32 %v429_v21, %v428_v12  ;;  %v436_v32 = vrot.slane %v435_v22, 2  ;;  %v409_v45 = vld [vmem:[%s1226_s8 + $0x1] sm:$0x1]  ;;  %v410_v46 = vld [vmem:[%s1226_s8 + $0x2] sm:$0x1]  ;;  %s878_s11 = scalar_lea.vmem %s1330_s5, 64 }
  0x88   : > { %v360_v33 = vadd.f32 %v338_v23, %v323_v18  ;;  %v345_v34 = vadd.f32 %v344_v24, %v343_v15  ;;  %v352_v35 = vadd.f32 %v351_v25, %v350_v16  ;;  %v357_v36 = vadd.f32 %v356_v26, %v355_v17  ;;  %v326_v47 = vld [vmem:[%s1216_s27 + $0x3] sm:$0x1]  ;;  %v411_v53 = vld [vmem:[%s1226_s8 + $0x3] sm:$0x1]  ;;  %p879_p7 = scmp.ne.s32.totalorder %s1330_s5, %s878_s11  ;;  %s1006_s18 = smov [#allocation7]  }
  0x89   : > { %v417_v38 = vrot.slane %v416_v29, 1  ;;  %v424_v39 = vrot.slane %v423_v30, 1  ;;  %v431_v40 = vrot.slane %v430_v31, 1  ;;  %v437_v41 = vadd.f32 %v436_v32, %v435_v22  ;;  %s882_s25 = sshll.u32 %s1006_s18, 4  ;;  %s883_s25 = int_to_ptr.vmem [resolvable:$false] %s882_s25 }
  0x8a   : > { %364 = vst [vmem:[%s1216_s27] sm:$0x1] %v360_v33  ;;  %v361_v42 = vadd.f32 %v345_v34, %v324_v27  ;;  %v362_v43 = vadd.f32 %v352_v35, %v325_v28  ;;  %v358_v44 = vrot.slane %v357_v36, 1  ;;  %p880_p10 = pnand %p879_p7, %p1441_p3  ;;  %s884_s0 = scalar_lea.vmem %s883_s25, 128 }
  0x8b   : > { %v418_v48 = vadd.f32 %v417_v38, %v416_v29  ;;  %v425_v49 = vadd.f32 %v424_v39, %v423_v30  ;;  %v432_v50 = vadd.f32 %v431_v40, %v430_v31  ;;  %v438_v51 = vrot.slane %v437_v41, 1  ;;  %p885_p9 = scmp.lt.s32.totalorder %s1330_s5, %s883_s25  ;;  %p886_p1 = scmp.lt.s32.totalorder %s884_s0, %s878_s11 }
  0x8c   : > { %365 = vst [vmem:[%s1216_s27 + $0x1] sm:$0x1] %v361_v42  ;;  %366 = vst [vmem:[%s1216_s27 + $0x2] sm:$0x1] %v362_v43  ;;  %v359_v52 = vadd.f32 %v358_v44, %v357_v36  ;;  %p881_p12 = pneg %p880_p10 }
  0x8d   : > { %v440_v54 = vadd.f32 %v418_v48, %v408_v37  ;;  %v441_v55 = vadd.f32 %v425_v49, %v409_v45  ;;  %v442_v56 = vadd.f32 %v432_v50, %v410_v46  ;;  %v439_v57 = vadd.f32 %v438_v51, %v437_v41  ;;  %p887_p6 = por %p886_p1, %p885_p9 }
  0x8e   : > { %v363_v58 = vadd.f32 %v359_v52, %v326_v47 }
  0x8f   : > { %444 = vst [vmem:[%s1226_s8] sm:$0x1] %v440_v54  ;;  %445 = vst [vmem:[%s1226_s8 + $0x1] sm:$0x1] %v441_v55  ;;  %v443_v59 = vadd.f32 %v439_v57, %v411_v53  ;;  %p888_p2 = pnand %p887_p6, %p881_p12 }
  0x90   : > { %446 = vst [vmem:[%s1226_s8 + $0x2] sm:$0x1] %v442_v56  ;;  %367 = vst [vmem:[%s1216_s27 + $0x3] sm:$0x1] %v363_v58 }
  0x91   : > { %447 = vst [vmem:[%s1226_s8 + $0x3] sm:$0x1] %v443_v59 }
  0x92   : > { %891 = shalt.err (!%p888_p2)
}
  0x93   : > { %s892_s27 = scalar_lea.hbm %s1328_s13, 64  ;;  %s896_s21 = scalar_lea.hbm %s1424_s2, 128 }
  0x94   : > { %p893_p5 = scmp.ne.s32.totalorder %s1328_s13, %s892_s27  ;;  %p897_p0 = scmp.lt.u32.totalorder %s1328_s13, %s1424_s2 }
  0x95   : > { %p898_p11 = scmp.lt.u32.totalorder %s896_s21, %s892_s27  ;;  %p900_p7 = scmp.lt.u32.totalorder %s892_s27, %s1328_s13 }
  0x96   : > { %p894_p13 = pnand %p893_p5, %p1441_p3 }
  0x97   : > { %p899_p4 = por %p898_p11, %p897_p0 }
  0x98   : > { %p895_p8 = pneg %p894_p13 }
  0x99   : > { %p901_p10 = por %p900_p7, %p899_p4 }
  0x9b   : > { %p902_p12 = pnand %p901_p10, %p895_p8 }
  0x9d   : > { %905 = shalt.err (!%p902_p12)
}
  0x9e   : > { %712 = dma.vmem_to_hbm [thread:$0]  (%p1441_p3), %s1330_s5, 64, %s1328_s13, %s449_s10, %s1004_s7, %s1004_s7, %s1005_s24  }
  0x9f   : > { %s906_s11 = scalar_lea.vmem %s1341_s26, 64  ;;  %s1007_s25 = smov [#allocation10]  }
  0xa0   : > { %p907_p9 = scmp.ne.s32.totalorder %s1341_s26, %s906_s11  ;;  %s910_s0 = sshll.u32 %s1007_s25, 4  ;;  %s911_s0 = int_to_ptr.vmem [resolvable:$false] %s910_s0 }
  0xa1   : > { %s912_s27 = scalar_lea.vmem %s911_s0, 128  ;;  %p913_p2 = scmp.lt.s32.totalorder %s1341_s26, %s911_s0 }
  0xa2   : > { %p908_p1 = pnand %p907_p9, %p1441_p3  ;;  %p914_p5 = scmp.lt.s32.totalorder %s912_s27, %s906_s11 }
  0xa4   : > { %p909_p6 = pneg %p908_p1  ;;  %p915_p13 = por %p914_p5, %p913_p2 }
  0xa6   : > { %p916_p8 = pnand %p915_p13, %p909_p6 }
  0xa8   : > { %919 = shalt.err (!%p916_p8)
}
  0xa9   : > { %s920_s12 = scalar_lea.hbm %s1339_s6, 64  ;;  %s924_s10 = scalar_lea.hbm %s1426_s4, 128 }
  0xaa   : > { %p921_p0 = scmp.ne.s32.totalorder %s1339_s6, %s920_s12  ;;  %p925_p7 = scmp.lt.u32.totalorder %s1339_s6, %s1426_s4 }
  0xab   : > { %p926_p10 = scmp.lt.u32.totalorder %s924_s10, %s920_s12  ;;  %p928_p9 = scmp.lt.u32.totalorder %s920_s12, %s1339_s6 }
  0xac   : > { %p922_p11 = pnand %p921_p0, %p1441_p3 }
  0xad   : > { %p927_p12 = por %p926_p10, %p925_p7 }
  0xae   : > { %p923_p4 = pneg %p922_p11 }
  0xaf   : > { %p929_p1 = por %p928_p9, %p927_p12 }
  0xb1   : > { %p930_p6 = pnand %p929_p1, %p923_p4 }
  0xb3   : > { %933 = shalt.err (!%p930_p6)
}
  0xb4   : > { %714 = dma.vmem_to_hbm [thread:$0]  (%p1441_p3), %s1341_s26, 64, %s1339_s6, %s1284_s14, %s1004_s7, %s1004_s7, %s1005_s24  }
  0xb5 PF: > { %s519_s21 = sand.u32 1, %s976_s15   ;;  %p1442_p2 = scmp.ne.s32.totalorder %s1434_s30, 0 }
  0xb6   : > { %p1443_p5 = scmp.ge.s32.totalorder %s996_s20, 2  ;;  %s520_s9 = scalar_lea.sflag [#allocation4], %s519_s21 }
  0xb8   : > { %p726_p13 = pnand %p1443_p5, %p1442_p2 }
  0xba   : > { %967 = dma.done.wait (!%p726_p13), %s520_s9, 64  }
  0xbb   : > { %969 = vsyncadd (!%p726_p13), %s520_s9, 4294967232  ;;  %s1444_s28 = sadd.s32 4294967294, %s996_s20  }
  0xbc   : > { %s528_s18 = sand.u32 1, %s1444_s28  }
  0xbd   : > { %s529_s11 = scalar_lea.sflag [#allocation9], %s528_s18 }
  0xbe   : > { %971 = dma.done.wait (!%p726_p13), %s529_s11, 128  }
  0xbf   : > { %973 = vsyncadd (!%p726_p13), %s529_s11, 4294967168  ;;  %s27_s20 = sadd.s32 1, %s996_s20   ;;  %s1445_s15 = smov %s980_s16 }
  0xc0   : > { %p24_p3 = scmp.ge.s32.totalorder %s27_s20, 4   ;;  %s1446_s16 = smov %s984_s17 }
  0xc1   : > { %s1447_s17 = smov %s1095_s29  ;;  %s1448_s18 = smov %s992_s19 }
  0xc2   : > { %s1449_s19 = smov %s1451_s23  ;;  %26 = sbr.rel (!%p24_p3) target bundleno = 12 (0xc), region = 122 }
  0xc9   :  { %543 = vsyncpa [#allocation3], 1 }
  0xca   :  { %545 = vsyncpa [#allocation3 + $0x1], 1 }
  0xcb   :  { %546 = vsyncpa [#allocation6], 1 }
  0xcc   :  { %548 = vsyncpa [#allocation6 + $0x1], 1 }
  0xcd   :  { %549 = vsyncpa [#allocation4], 1 }
  0xce   :  { %551 = vsyncpa [#allocation4 + $0x1], 1 }
  0xcf   :  { %552 = vsyncpa [#allocation9], 1 }
  0xd0   :  { %554 = vsyncpa [#allocation9 + $0x1], 1 }

</bundles_post_ra>
